<compile_context>
chip_gen: v7x
topology: tpu7x:2x2x1
jax: 0.10.0
libtpu: 0.0.40
codegen_flags: <defaults>
</compile_context>

<pallas_src>
import jax
import jax.numpy as jnp
from jax.experimental import pallas as pl
from jax.experimental.pallas import tpu as pltpu

LANES = 128
SMALL_THRESHOLD_BYTES = 1 << 20      # below ~1 MiB a kernel launch costs more than it saves
MIN_GRID_STEPS = 8                   # keep the pipeline deep enough to overlap DMA
                                     # (>=4 steps per TC even after a v7x 2-way core split)
_DEFAULT_TILE_BYTES = 4 << 20        # 4 MiB/buffer -> ~16 MiB live (in+out, double-buffered)
_BIG_VMEM_TILE_BYTES = 8 << 20       # only on generations with >=100 MiB VMEM (v5e/v6e)


def _target_tile_bytes():
    # Generation-aware tile target: v7x has only 64 MiB VMEM/TC (32 MiB scoped
    # default), so stay at 4 MiB/buffer there; v5e/v6e (128 MiB) can take 8 MiB.
    try:
        if pltpu.get_tpu_info().vmem_capacity_bytes >= (100 << 20):
            return _BIG_VMEM_TILE_BYTES
    except Exception:
        pass
    return _DEFAULT_TILE_BYTES


def _round_up(a, m):
    return (a + m - 1) // m * m


def _scale_kernel(w_ref, x_ref, o_ref):
    # w_ref is an SMEM scalar; x_ref/o_ref are VMEM row tiles.  The astype keeps
    # the store correct for bf16 inputs (f32 scalar * bf16 vreg promotes to f32);
    # it's a free VPU op in the f32 case.
    o_ref[...] = (w_ref[0] * x_ref[...]).astype(o_ref.dtype)


def gauto_encoder_forward(x, w, *, donate_input=False, force_pallas=False):
    """Pallas implementation of GAutoEncoder.forward: return w * x.

    x: [B, C, H, W] (any float dtype, NCHW like the PyTorch module)
    w: [1]          (scalar parameter, init 0.1)
    """
    n = x.size
    itemsize = jnp.dtype(x.dtype).itemsize

    # Tiny / ragged inputs (and any call site where XLA could fuse w*x with its
    # producer/consumer) are strictly better on plain XLA: a standalone kernel
    # forces a dedicated HBM read+write pass.
    if n % LANES != 0 or (not force_pallas and n * itemsize < SMALL_THRESHOLD_BYTES):
        return (w[0] * x).astype(x.dtype)

    rows = n // LANES
    x2d = x.reshape(rows, LANES)          # lane-dense slab: no padding, no copy tax

    # Sublane packing: f32 -> 8 rows/vreg, bf16 -> 16, int8/fp8 -> 32; keeping
    # the tile a multiple of this keeps stores full-vreg / unmasked.
    row_align = max(8, 32 // itemsize)

    # Row-tile size: target ~4 MiB/buffer (8 MiB on 128 MiB-VMEM chips) so the
    # ~0.35 us per-step overhead is <10% of the per-step HBM time, but never let
    # the grid get shallower than MIN_GRID_STEPS or the double-buffering has
    # nothing to overlap (input DMA / compute / writeback would serialize).
    max_tile_rows = max(row_align, _target_tile_bytes() // (LANES * itemsize))
    depth_rows = _round_up(pl.cdiv(rows, MIN_GRID_STEPS), row_align)
    tr = max(row_align, min(max_tile_rows, depth_rows))

    grid = (pl.cdiv(rows, tr),)           # ragged last block handled by Pallas

    tile_bytes = tr * LANES * itemsize
    # in + out, each double-buffered = ~4 * tile_bytes live; leave headroom for
    # Mosaic internal scratch (never push v7x's 32 MiB scoped default to the edge).
    vmem_limit = (32 << 20) if tile_bytes <= (4 << 20) else (48 << 20)

    out2d = pl.pallas_call(
        _scale_kernel,
        out_shape=jax.ShapeDtypeStruct((rows, LANES), x.dtype),
        grid=grid,
        in_specs=[
            pl.BlockSpec(memory_space=pltpu.SMEM),        # w (scalar parameter)
            pl.BlockSpec((tr, LANES), lambda i: (i, 0)),  # x row tile
        ],
        out_specs=pl.BlockSpec((tr, LANES), lambda i: (i, 0)),
        # Only alias x -> out when the caller guarantees x is donated; otherwise
        # XLA inserts a defensive copy that costs more than the alias saves.
        input_output_aliases=({1: 0} if donate_input else {}),
        compiler_params=pltpu.CompilerParams(
            # Row axis is embarrassingly parallel: shards across both TCs on
            # v7x, harmless no-op on single-TC v5e/v6e.  Default double
            # buffering only (bandwidth-limited, not latency-limited).
            # TODO(synk): confirm via xprof that "parallel" really gives the
            # 2-way TC split on v7x; if not, switch to pltpu.CORE_PARALLEL.
            dimension_semantics=("parallel",),
            vmem_limit_bytes=vmem_limit,
        ),
    )(w, x2d)

    return out2d.reshape(x.shape)

    # TODO(synk): the PyTorch forward has dead code after `return self.w * x`
    # (self.decoder(self.encoder(x))) which never executes; not implemented.


if __name__ == "__main__":
    key = jax.random.PRNGKey(0)
    # Deterministic parameter init matching nn.Parameter(torch.Tensor([0.1]))
    w = jnp.array([0.1], dtype=jnp.float32)

    # Small shape from the module spec (takes the fusable XLA short-circuit path).
    x_small = jax.random.normal(key, (2, 4, 16, 16), dtype=jnp.float32)
    out_small = jax.block_until_ready(gauto_encoder_forward(x_small, w))
    assert out_small.shape == x_small.shape and out_small.dtype == x_small.dtype
    assert jnp.allclose(out_small, w[0] * x_small, atol=1e-6), "small mismatch"

    # Same small shape forced through the Pallas path (grid=(2,)) for coverage.
    out_small_pl = jax.block_until_ready(
        gauto_encoder_forward(x_small, w, force_pallas=True))
    assert jnp.allclose(out_small_pl, w[0] * x_small, atol=1e-6), "small pallas mismatch"

    # Larger shape exercises the tiled Pallas path with a >= MIN_GRID_STEPS grid
    # (rows=4096 -> tr=512 -> grid=(8,)), so the DMA pipeline actually overlaps.
    x_big = jax.random.normal(key, (8, 16, 64, 64), dtype=jnp.float32)
    out_big = jax.block_until_ready(gauto_encoder_forward(x_big, w))
    assert out_big.shape == x_big.shape and out_big.dtype == x_big.dtype
    assert jnp.allclose(out_big, w[0] * x_big, atol=1e-6), "big mismatch"

    # bf16 path: tile rows double (same ~bytes per DMA), alignment stays 16.
    x_bf16 = jax.random.normal(key, (8, 16, 64, 64), dtype=jnp.bfloat16)
    out_bf16 = jax.block_until_ready(gauto_encoder_forward(x_bf16, w))
    assert out_bf16.dtype == jnp.bfloat16
    assert jnp.allclose(out_bf16.astype(jnp.float32),
                        (w[0] * x_bf16).astype(jnp.float32), atol=1e-2), "bf16 mismatch"

    print("KERNEL_OK")
</pallas_src>

<mosaic_0001>
module attributes {stable_mosaic.version = 11 : i64} {
  func.func @_scale_kernel(%arg0: i32, %arg1: memref<1xf32, #tpu.memory_space<smem>>, %arg2: memref<8x128xf32, #tpu.memory_space<vmem>>, %arg3: memref<8x128xf32, #tpu.memory_space<vmem>>) attributes {dimension_semantics = [#tpu.dimension_semantics<parallel>], iteration_bounds = array<i64: 2>, scalar_prefetch = 0 : i64, scratch_operands = 0 : i64, tpu.core_type = #tpu.core_type<tc>, window_params = [{transform_indices = @transform_0, window_bounds = array<i64: 1>}, {transform_indices = @transform_1, window_bounds = array<i64: 8, 128>}, {transform_indices = @transform_2, window_bounds = array<i64: 8, 128>}]} {
    %c0 = arith.constant 0 : index
    %0 = memref.load %arg1[%c0] : memref<1xf32, #tpu.memory_space<smem>>
    %c0_0 = arith.constant 0 : index
    %c0_1 = arith.constant 0 : index
    %1 = vector.load %arg2[%c0_0, %c0_1] : memref<8x128xf32, #tpu.memory_space<vmem>>, vector<8x128xf32>
    %2 = vector.broadcast %0 : f32 to vector<8x128xf32>
    %3 = arith.mulf %2, %1 : vector<8x128xf32>
    %c0_2 = arith.constant 0 : index
    %c0_3 = arith.constant 0 : index
    %4 = vector.load %arg3[%c0_2, %c0_3] : memref<8x128xf32, #tpu.memory_space<vmem>>, vector<8x128xf32>
    tpu.vector_store %arg3[%c0_2, %c0_3], %3 {strides = array<i32>} : memref<8x128xf32, #tpu.memory_space<vmem>>, vector<8x128xf32>,
    return
  }
  func.func @transform_0(%arg0: i32) -> i32 {
    %c0_i32 = arith.constant 0 : i32
    %c0_i32_0 = arith.constant 0 : i32
    return %c0_i32 : i32
  }
  func.func @transform_1(%arg0: i32) -> (i32, i32) {
    %c0_i32 = arith.constant 0 : i32
    %c0_i32_0 = arith.constant 0 : i32
    return %arg0, %c0_i32 : i32, i32
  }
  func.func @transform_2(%arg0: i32) -> (i32, i32) {
    %c0_i32 = arith.constant 0 : i32
    %c0_i32_0 = arith.constant 0 : i32
    return %arg0, %c0_i32 : i32, i32
  }
}

</mosaic_0001>

<bundles_post_ra>
// kernel: tpu_custom_call.1
= control target key start
LH: loop header
LB: loop body
LE: loop exit
PB: predicated region body
PF: predicated region fallthrough
CT: control target
= control target key end

     0   :  { %s586_s0 = inlined_call_operand.<no memory space> [shape: f32[1], index: 0, kind: input, shape index: {}]   ;;  %s587_s1 = inlined_call_operand.hbm [shape: f32[16,128], index: 1, kind: input, shape index: {}]   ;;  %s588_s2 = inlined_call_operand.hbm [shape: f32[16,128], index: 2, kind: output, shape index: {}]  }
   0x1   :  { %7 = sst [smem:[#allocation2]] %s586_s0 }
   0x2   :  { %8 = vsyncpa [#allocation4], 0 }
   0x3   :  { %10 = vsyncpa [#allocation4 + $0x1], 0 }
   0x4   :  { %11 = vsyncpa [#allocation5], 0 }
   0x5   :  { %13 = vsyncpa [#allocation5 + $0x1], 0  ;;  %s425_s11 = smov 0   ;;  %s427_s12 = smov 0  }
   0x6   :  { %s429_s13 = smov 0   ;;  %s431_s14 = smov 0  }
   0x7 LB: > { %s446_s0 = sadd.s32 4294967295, %s403_s14   ;;  %s249_s15 = sadd.s32 4294967294, %s403_s14   ;;  %s403_s14 = sphi %s431_s14, %s603_s14   ;;  %s399_s13 = sphi %s429_s13, %s602_s13   ;;  %s395_s12 = sphi %s427_s12, %s601_s12   ;;  %s391_s11 = sphi %s425_s11, %s600_s11  }
   0x8   : > { %s450_s16 = sadd.s32 1, %s403_s14   ;;  %s47_s17 = sadd.s32 1, %s399_s13 }
   0x9   : > { %s44_s18 = ssub.s32 %s403_s14, %s450_s16  ;;  %p54_p0 = scmp.ne.s32.totalorder %s399_s13, %s395_s12 }
   0xa   : > { %p45_p1 = scmp.eq.s32.totalorder %s44_s18, 0  ;;  %p55_p2 = scmp.eq.s32.totalorder %s403_s14, 0 }
   0xb   : > { %p60_p3 = scmp.ne.s32.totalorder %s395_s12, %s391_s11  ;;  %p61_p4 = scmp.eq.s32.totalorder %s446_s0, 0 }
   0xc   : > { %s462_s19 = scalar_select %p45_p1, %s399_s13, %s47_s17  }
   0xd   : > { %p464_p5 = por %p55_p2, %p54_p0  ;;  %p468_p6 = por %p61_p4, %p60_p3 }
   0xe   : > { %p84_p7 = scmp.eq.s32.totalorder %s446_s0, 1  ;;  %p90_p8 = scmp.eq.s32.totalorder %s249_s15, 1 }
   0xf   : > { %p273_p10 = scmp.lt.s32.totalorder %s403_s14, 2  ;;  %s113_s24 = sand.u32 1, %s399_s13  }
  0x10   : > { %p475_p11 = por %p84_p7, %p54_p0  ;;  %p479_p12 = por %p90_p8, %p60_p3 }
  0x11   : > { %s253_s25 = sshll.u32 %s403_s14, 7  ;;  %s252_s26 = sshll.u32 %s113_s24, 3 }
  0x12   : > { %s592_s22 = scalar_select %p475_p11, 1, 0 }
  0x13   : > { %s593_s23 = scalar_select %p479_p12, 1, 0 }
  0x14   : > { %s488_s29 = scalar_lea.hbm %s587_s1, %s253_s25  ;;  %s117_s30 = scalar_lea.vmem [#allocation3], %s252_s26 }
  0x15   : > { %s124_s3 = sshll.u32 %s117_s30, 4  ;;  %p492_p13 = pnand %p273_p10, %p464_p5  ;;  %s496_s3 = int_to_ptr.vmem [resolvable:$true] %s124_s3 }
  0x16   : > { %s114_s5 = scalar_lea.sflag [#allocation4], %s113_s24  ;;  %s307_s6 = scalar_lea.hbm %s488_s29, 128 }
  0x17   : > { %p308_p2 = scmp.ne.s32.totalorder %s488_s29, %s307_s6  ;;  %p309_p3 = pneg %p492_p13 }
  0x18   : > { %s312_s9 = scalar_lea.hbm %s587_s1, 256  ;;  %p313_p5 = scmp.lt.u32.totalorder %s488_s29, %s587_s1 }
  0x19   : > { %p310_p4 = pnand %p309_p3, %p308_p2  ;;  %p314_p8 = scmp.lt.u32.totalorder %s312_s9, %s307_s6 }
  0x1a   : > { %p316_p9 = scmp.lt.u32.totalorder %s307_s6, %s488_s29 }
  0x1b   : > { %p311_p7 = pneg %p310_p4  ;;  %p315_p10 = por %p314_p8, %p313_p5 }
  0x1d   : > { %p317_p0 = por %p316_p9, %p315_p10 }
  0x1f   : > { %p318_p1 = pnand %p317_p0, %p311_p7 }
  0x21   : > { %321 = shalt.err (!%p318_p1)
}
  0x22   : > { %s322_s17 = scalar_lea.vmem %s496_s3, 128  ;;  %s405_s18 = smov [#allocation3]  }
  0x23   : > { %p323_p2 = scmp.ne.s32.totalorder %s496_s3, %s322_s17  ;;  %s327_s20 = sshll.u32 %s405_s18, 4  ;;  %s328_s20 = int_to_ptr.vmem [resolvable:$false] %s327_s20 }
  0x24   : > { %s329_s24 = scalar_lea.vmem %s328_s20, 256  ;;  %p330_p11 = scmp.lt.s32.totalorder %s496_s3, %s328_s20 }
  0x25   : > { %p325_p4 = pnand %p323_p2, %p309_p3  ;;  %p331_p5 = scmp.lt.s32.totalorder %s329_s24, %s322_s17 }
  0x27   : > { %p326_p12 = pneg %p325_p4  ;;  %p332_p8 = por %p331_p5, %p330_p11 }
  0x29   : > { %p333_p9 = pnand %p332_p8, %p326_p12 }
  0x2b   : > { %336 = shalt.err (!%p333_p9)
}
  0x2c   : > { %268 = dma.hbm_to_vmem [thread:$0]  (!%p492_p13), %s488_s29, 128, %s496_s3, %s114_s5  }
  0x2d   : > { %p595_p0 = scmp.lt.s32.totalorder %s403_s14, 3  ;;  %p596_p1 = scmp.ge.s32.totalorder %s403_s14, 1 }
  0x2f   : > { %p130_p3 = pnand %p596_p1, %p595_p0 }
  0x30   : > { %s530_s25 = sand.u32 (!%p130_p3), 1, %s395_s12  }
  0x31   : > { %133 = sbr.rel (%p130_p3) target bundleno = 83 (0x53), region = 28  ;;  %s255_s26 = sshll.u32 (!%p130_p3), %s530_s25, 3 }
  0x32   : > { %s136_s27 = scalar_lea.sflag (!%p130_p3), [#allocation4], %s530_s25  ;;  %s139_s28 = scalar_lea.vmem (!%p130_p3), [#allocation3], %s255_s26 }
  0x38   : > { %382 = dma.done.wait (%p468_p6), %s136_s27, 128  }
  0x39   : > { %384 = vsyncadd (%p468_p6), %s136_s27, 4294967168  ;;  %s160_s29 = sld [smem:[#allocation2]]  ;;  %s159_s30 = scalar_lea.vmem [#allocation6], %s255_s26  ;;  %v161_v0 = vld [vmem:[%s139_s28] sm:$0xff] }
  0x3a   : > { %s179_s3 = sshll.u32 %s159_s30, 4  ;;  %s258_s4 = sshll.u32 %s446_s0, 7  ;;  %s539_s3 = int_to_ptr.vmem [resolvable:$true] %s179_s3 }
  0x3b   : > { %s544_s21 = scalar_lea.hbm %s588_s2, %s258_s4  ;;  %s166_s7 = scalar_lea.sflag [#allocation5], %s530_s25 }
  0x3c   : > { %s337_s8 = scalar_lea.vmem %s539_s3, 128  ;;  %p597_p11 = scmp.ne.s32.totalorder %s592_s22, 0 }
  0x3d   : > { %p338_p6 = scmp.ne.s32.totalorder %s539_s3, %s337_s8  ;;  %s406_s0 = smov [#allocation6]  }
  0x3e   : > { %s341_s9 = sshll.u32 %s406_s0, 4  ;;  %s342_s9 = int_to_ptr.vmem [resolvable:$false] %s341_s9 }
  0x3f   : > { %v162_v1 = vstv %s160_s29  ;;  %p339_p12 = pnand %p338_p6, %p597_p11  ;;  %s343_s10 = scalar_lea.vmem %s342_s9, 256 }
  0x40   : > { %v163_v2 = vmul.f32 %v162_v1, %v161_v0  ;;  %p344_p7 = scmp.lt.s32.totalorder %s539_s3, %s342_s9  ;;  %p345_p10 = scmp.lt.s32.totalorder %s343_s10, %s337_s8 }
  0x41   : > { %p340_p13 = pneg %p339_p12 }
  0x42   : > { %164 = vst [vmem:[%s159_s30] sm:$0xff] %v163_v2  ;;  %p346_p2 = por %p345_p10, %p344_p7 }
  0x44   : > { %p347_p4 = pnand %p346_p2, %p340_p13 }
  0x46   : > { %350 = shalt.err (!%p347_p4)
}
  0x47   : > { %s351_s15 = scalar_lea.hbm %s544_s21, 128  ;;  %s355_s20 = scalar_lea.hbm %s588_s2, 256 }
  0x48   : > { %p352_p5 = scmp.ne.s32.totalorder %s544_s21, %s351_s15  ;;  %p356_p0 = scmp.lt.u32.totalorder %s544_s21, %s588_s2 }
  0x49   : > { %p357_p1 = scmp.lt.u32.totalorder %s355_s20, %s351_s15  ;;  %p359_p6 = scmp.lt.u32.totalorder %s351_s15, %s544_s21 }
  0x4a   : > { %p353_p8 = pnand %p352_p5, %p597_p11 }
  0x4b   : > { %p358_p3 = por %p357_p1, %p356_p0 }
  0x4c   : > { %p354_p9 = pneg %p353_p8 }
  0x4d   : > { %p360_p12 = por %p359_p6, %p358_p3 }
  0x4f   : > { %p361_p13 = pnand %p360_p12, %p354_p9 }
  0x51   : > { %364 = shalt.err (!%p361_p13)
}
  0x52   : > { %263 = dma.vmem_to_hbm [thread:$0]  (%p597_p11), %s539_s3, 128, %s544_s21, %s166_s7  }
  0x53 PF: > { %s191_s26 = sand.u32 1, %s391_s11   ;;  %p598_p7 = scmp.ne.s32.totalorder %s593_s23, 0 }
  0x54   : > { %p599_p10 = scmp.ge.s32.totalorder %s403_s14, 2  ;;  %s192_s27 = scalar_lea.sflag [#allocation5], %s191_s26 }
  0x56   : > { %p270_p2 = pnand %p599_p10, %p598_p7 }
  0x58   : > { %386 = dma.done.wait (!%p270_p2), %s192_s27, 128  }
  0x59   : > { %388 = vsyncadd (!%p270_p2), %s192_s27, 4294967168  ;;  %p16_p4 = scmp.ge.s32.totalorder %s450_s16, 4   ;;  %s600_s11 = smov %s395_s12 }
  0x5a   : > { %s601_s12 = smov %s399_s13  ;;  %s602_s13 = smov %s462_s19 }
  0x5b   : > { %s603_s14 = smov %s450_s16  ;;  %18 = sbr.rel (!%p16_p4) target bundleno = 7 (0x7), region = 73 }
  0x62   :  { %197 = vsyncpa [#allocation4], 1 }
  0x63   :  { %199 = vsyncpa [#allocation4 + $0x1], 1 }
  0x64   :  { %200 = vsyncpa [#allocation5], 1 }
  0x65   :  { %202 = vsyncpa [#allocation5 + $0x1], 1 }

</bundles_post_ra>
